<compile_context>
chip_gen: v7x
topology: tpu7x:2x2x1
jax: 0.10.0
libtpu: 0.0.40
codegen_flags: <defaults>
</compile_context>

<pallas_src>
import math

import jax
import jax.numpy as jnp
from jax.experimental import pallas as pl
from jax.experimental.pallas import tpu as pltpu


_LANES = 128


def _vmem_capacity_bytes() -> int:
    """Best-effort physical VMEM capacity; conservative fallback (v7x, 64 MiB)."""
    try:
        info = pltpu.get_tpu_info()
        cap = getattr(info, "vmem_capacity_bytes", None)
        if cap:
            return int(cap)
    except Exception:
        pass
    return 64 * 1024 * 1024


_VMEM_CAP = _vmem_capacity_bytes()
# ~8 MiB blocks on all current generations (v5e/v6e have 128 MiB VMEM, v7x has
# 64 MiB); shrink proportionally if the reported capacity is unusually small.
_TARGET_BLOCK_BYTES = max(512 * 1024, min(8 * 1024 * 1024, _VMEM_CAP // 8))
# 2 input + 2 output double buffers = 4x block, plus headroom; keep well inside
# physical VMEM (this only raises the *scoped* limit, which defaults too low
# for >2 MiB blocks on v5e).
_VMEM_LIMIT_BYTES = int(min(_VMEM_CAP * 3 // 4,
                            4 * _TARGET_BLOCK_BYTES + 8 * 1024 * 1024))


def _make_kernel(scale: float):
    def kernel(x_ref, o_ref):
        # Pure VPU elementwise multiply; compute in f32 (free -- DMA bound) and
        # cast back so bf16/fp8/int inputs don't truncate the scale constant.
        x = x_ref[...].astype(jnp.float32)
        o_ref[...] = (x * jnp.float32(scale)).astype(o_ref.dtype)
    return kernel


def _run_2d(x2d: jax.Array, scale: float) -> jax.Array:
    """Runs the elementwise kernel over a lane-dense (rows, 128) slab."""
    rows, lanes = x2d.shape
    itemsize = jnp.dtype(x2d.dtype).itemsize
    # dtype-aware sublane multiple: 8 (f32), 16 (bf16/f16), 32 (int8/fp8).
    sub = 8 * max(1, 4 // itemsize)

    if rows <= sub:
        # Single block equal to the full array dims -- exact, no oversized
        # masked block, no grid overhead.
        tr = rows
    else:
        # ~_TARGET_BLOCK_BYTES per block, rounded down to a sublane multiple.
        tr = max(sub, (_TARGET_BLOCK_BYTES // (lanes * itemsize)) // sub * sub)
        # Guarantee >= 2 grid steps whenever the input spans more than one
        # minimum tile, so the "parallel" axis actually feeds both v7x
        # TensorCores (no measurable cost on single-TC v5e/v6e).
        half_rows = pl.cdiv(pl.cdiv(rows, 2), sub) * sub
        tr = min(tr, half_rows)

    grid = (pl.cdiv(rows, tr),)  # last block may be partial; Pallas masks it.

    return pl.pallas_call(
        _make_kernel(scale),
        out_shape=jax.ShapeDtypeStruct((rows, lanes), x2d.dtype),
        grid_spec=pltpu.PrefetchScalarGridSpec(
            num_scalar_prefetch=0,
            grid=grid,
            in_specs=[pl.BlockSpec((tr, lanes), lambda i: (i, 0))],
            out_specs=pl.BlockSpec((tr, lanes), lambda i: (i, 0)),
        ),
        compiler_params=pltpu.CompilerParams(
            dimension_semantics=("parallel",),
            vmem_limit_bytes=_VMEM_LIMIT_BYTES,
        ),
    )(x2d)


def deg2rad(x: jax.Array) -> jax.Array:
    """Converts angles from degrees to radians (same shape as input)."""
    x = jnp.asarray(x)
    orig_shape = x.shape

    if jnp.issubdtype(x.dtype, jnp.floating):
        scale = math.pi / 180.0
        out_dtype = x.dtype
    else:
        # Reference casts pi to the input dtype first (int -> 3); the `/ 180.0`
        # then promotes to float32.  Reproduce that promotion explicitly.
        scale = 3.0 / 180.0
        out_dtype = jnp.float32
        x = x.astype(jnp.float32)

    n = x.size
    if n == 0:
        return x.reshape(orig_shape)

    flat = x.reshape(-1)

    if n % _LANES == 0:
        # Fast path: free reshape to a lane-dense slab, zero extra HBM traffic.
        out2d = _run_2d(flat.reshape(n // _LANES, _LANES), scale)
        return out2d.reshape(orig_shape)

    # Ragged: kernel on the 128-aligned prefix, fused jnp multiply on the
    # < 128-element tail (a Pallas launch for a sub-vreg remainder is pure
    # overhead), then stitch back together.  No full-array pad is materialized.
    n_main = (n // _LANES) * _LANES
    tail = (flat[n_main:].astype(jnp.float32) * jnp.float32(scale)).astype(out_dtype)
    if n_main == 0:
        return tail.reshape(orig_shape)
    head = _run_2d(flat[:n_main].reshape(n_main // _LANES, _LANES), scale).reshape(-1)
    return jnp.concatenate([head, tail]).reshape(orig_shape)


class DegToRad:
    """JAX/Pallas equivalent of torchgeometry's DegToRad module (no params)."""

    def __init__(self):
        pass

    def __call__(self, x: jax.Array) -> jax.Array:
        return deg2rad(x)


if __name__ == "__main__":
    key = jax.random.PRNGKey(0)
    mod = DegToRad()

    # 128-aligned path (2*4*16*16 = 2048 elements, f32) -> multi-step grid.
    x = 360.0 * jax.random.uniform(key, (2, 4, 16, 16), dtype=jnp.float32)
    out = jax.block_until_ready(mod(x))
    ref = x * (math.pi / 180.0)
    assert out.shape == x.shape and out.dtype == x.dtype
    assert jnp.allclose(out, ref, rtol=1e-6, atol=1e-6)

    # Ragged path with an aligned prefix + <128-element tail (3*5*9 = 135).
    y = 360.0 * jax.random.uniform(jax.random.PRNGKey(1), (3, 5, 9), dtype=jnp.float32)
    out_y = jax.block_until_ready(mod(y))
    assert out_y.shape == y.shape and out_y.dtype == y.dtype
    assert jnp.allclose(out_y, y * (math.pi / 180.0), rtol=1e-6, atol=1e-6)

    # Tiny ragged (< 128 elements) path.
    z = 360.0 * jax.random.uniform(jax.random.PRNGKey(2), (3, 5, 7), dtype=jnp.float32)
    out_z = jax.block_until_ready(mod(z))
    assert out_z.shape == z.shape
    assert jnp.allclose(out_z, z * (math.pi / 180.0), rtol=1e-6, atol=1e-6)

    # Integer input: reference truncates pi to 3 before the float divide.
    w = jnp.arange(2 * 64, dtype=jnp.int32).reshape(2, 64)
    out_w = jax.block_until_ready(mod(w))
    ref_w = w.astype(jnp.float32) * (3.0 / 180.0)
    assert out_w.dtype == jnp.float32
    assert jnp.allclose(out_w, ref_w, rtol=1e-6, atol=1e-6)

    print("KERNEL_OK")
</pallas_src>

<mosaic_0001>
module attributes {stable_mosaic.version = 11 : i64} {
  func.func @kernel(%arg0: i32, %arg1: memref<8x128xf32, #tpu.memory_space<vmem>>, %arg2: memref<8x128xf32, #tpu.memory_space<vmem>>) attributes {dimension_semantics = [#tpu.dimension_semantics<parallel>], iteration_bounds = array<i64: 2>, scalar_prefetch = 0 : i64, scratch_operands = 0 : i64, tpu.core_type = #tpu.core_type<tc>, window_params = [{transform_indices = @transform_0, window_bounds = array<i64: 8, 128>}, {transform_indices = @transform_1, window_bounds = array<i64: 8, 128>}]} {
    %c0 = arith.constant 0 : index
    %c0_0 = arith.constant 0 : index
    %0 = vector.load %arg1[%c0, %c0_0] : memref<8x128xf32, #tpu.memory_space<vmem>>, vector<8x128xf32>
    %cst = arith.constant 0.0174532924 : f32
    %1 = vector.broadcast %cst : f32 to vector<8x128xf32>
    %2 = arith.mulf %0, %1 : vector<8x128xf32>
    %c0_1 = arith.constant 0 : index
    %c0_2 = arith.constant 0 : index
    %3 = vector.load %arg2[%c0_1, %c0_2] : memref<8x128xf32, #tpu.memory_space<vmem>>, vector<8x128xf32>
    tpu.vector_store %arg2[%c0_1, %c0_2], %2 {strides = array<i32>} : memref<8x128xf32, #tpu.memory_space<vmem>>, vector<8x128xf32>,
    return
  }
  func.func @transform_0(%arg0: i32) -> (i32, i32) {
    %c0_i32 = arith.constant 0 : i32
    %c0_i32_0 = arith.constant 0 : i32
    return %arg0, %c0_i32 : i32, i32
  }
  func.func @transform_1(%arg0: i32) -> (i32, i32) {
    %c0_i32 = arith.constant 0 : i32
    %c0_i32_0 = arith.constant 0 : i32
    return %arg0, %c0_i32 : i32, i32
  }
}

</mosaic_0001>

<bundles_post_ra>
// kernel: tpu_custom_call.1
= control target key start
LH: loop header
LB: loop body
LE: loop exit
PB: predicated region body
PF: predicated region fallthrough
CT: control target
= control target key end

     0   :  { %6 = vsyncpa [#allocation3], 0  ;;  %s548_s0 = inlined_call_operand.hbm [shape: f32[16,128], index: 0, kind: input, shape index: {}]   ;;  %s549_s1 = inlined_call_operand.hbm [shape: f32[16,128], index: 1, kind: output, shape index: {}]  }
   0x1   :  { %8 = vsyncpa [#allocation3 + $0x1], 0 }
   0x2   :  { %9 = vsyncpa [#allocation4], 0 }
   0x3   :  { %11 = vsyncpa [#allocation4 + $0x1], 0  ;;  %s387_s6 = smov 0   ;;  %s389_s7 = smov 0  }
   0x4   :  { %s391_s8 = smov 0   ;;  %s393_s9 = smov 0  }
   0x5 LB: > { %s408_s10 = sadd.s32 4294967295, %s373_s9   ;;  %s219_s11 = sadd.s32 4294967294, %s373_s9   ;;  %s373_s9 = sphi %s393_s9, %s564_s9   ;;  %s369_s8 = sphi %s391_s8, %s563_s8   ;;  %s365_s7 = sphi %s389_s7, %s562_s7   ;;  %s361_s6 = sphi %s387_s6, %s561_s6  }
   0x6   : > { %s412_s12 = sadd.s32 1, %s373_s9   ;;  %s24_s13 = sadd.s32 1, %s369_s8 }
   0x7   : > { %s21_s14 = ssub.s32 %s373_s9, %s412_s12  ;;  %p31_p0 = scmp.ne.s32.totalorder %s369_s8, %s365_s7 }
   0x8   : > { %p22_p1 = scmp.eq.s32.totalorder %s21_s14, 0  ;;  %p32_p2 = scmp.eq.s32.totalorder %s373_s9, 0 }
   0x9   : > { %p37_p3 = scmp.ne.s32.totalorder %s365_s7, %s361_s6  ;;  %p38_p4 = scmp.eq.s32.totalorder %s408_s10, 0 }
   0xa   : > { %s424_s15 = scalar_select %p22_p1, %s369_s8, %s24_s13  }
   0xb   : > { %p426_p5 = por %p32_p2, %p31_p0  ;;  %p430_p6 = por %p38_p4, %p37_p3 }
   0xc   : > { %p61_p7 = scmp.eq.s32.totalorder %s408_s10, 1  ;;  %p67_p8 = scmp.eq.s32.totalorder %s219_s11, 1 }
   0xd   : > { %p243_p10 = scmp.lt.s32.totalorder %s373_s9, 2  ;;  %s87_s20 = sand.u32 1, %s369_s8  }
   0xe   : > { %p437_p11 = por %p61_p7, %p31_p0  ;;  %p441_p12 = por %p67_p8, %p37_p3 }
   0xf   : > { %s223_s21 = sshll.u32 %s373_s9, 7  ;;  %s222_s22 = sshll.u32 %s87_s20, 3 }
  0x10   : > { %s553_s18 = scalar_select %p437_p11, 1, 0 }
  0x11   : > { %s554_s19 = scalar_select %p441_p12, 1, 0 }
  0x12   : > { %s450_s25 = scalar_lea.hbm %s548_s0, %s223_s21  ;;  %s91_s26 = scalar_lea.vmem [#allocation2], %s222_s22 }
  0x13   : > { %s98_s27 = sshll.u32 %s91_s26, 4  ;;  %p454_p13 = pnand %p243_p10, %p426_p5  ;;  %s458_s27 = int_to_ptr.vmem [resolvable:$true] %s98_s27 }
  0x14   : > { %s88_s29 = scalar_lea.sflag [#allocation3], %s87_s20  ;;  %s277_s30 = scalar_lea.hbm %s450_s25, 128 }
  0x15   : > { %p278_p2 = scmp.ne.s32.totalorder %s450_s25, %s277_s30  ;;  %p279_p3 = pneg %p454_p13 }
  0x16   : > { %s282_s4 = scalar_lea.hbm %s548_s0, 256  ;;  %p283_p5 = scmp.lt.u32.totalorder %s450_s25, %s548_s0 }
  0x17   : > { %p280_p4 = pnand %p279_p3, %p278_p2  ;;  %p284_p8 = scmp.lt.u32.totalorder %s282_s4, %s277_s30 }
  0x18   : > { %p286_p9 = scmp.lt.u32.totalorder %s277_s30, %s450_s25 }
  0x19   : > { %p281_p7 = pneg %p280_p4  ;;  %p285_p10 = por %p284_p8, %p283_p5 }
  0x1b   : > { %p287_p0 = por %p286_p9, %p285_p10 }
  0x1d   : > { %p288_p1 = pnand %p287_p0, %p281_p7 }
  0x1f   : > { %291 = shalt.err (!%p288_p1)
}
  0x20   : > { %s292_s13 = scalar_lea.vmem %s458_s27, 128  ;;  %s375_s14 = smov [#allocation2]  }
  0x21   : > { %p293_p2 = scmp.ne.s32.totalorder %s458_s27, %s292_s13  ;;  %s297_s16 = sshll.u32 %s375_s14, 4  ;;  %s298_s16 = int_to_ptr.vmem [resolvable:$false] %s297_s16 }
  0x22   : > { %s299_s20 = scalar_lea.vmem %s298_s16, 256  ;;  %p300_p11 = scmp.lt.s32.totalorder %s458_s27, %s298_s16 }
  0x23   : > { %p295_p4 = pnand %p293_p2, %p279_p3  ;;  %p301_p5 = scmp.lt.s32.totalorder %s299_s20, %s292_s13 }
  0x25   : > { %p296_p12 = pneg %p295_p4  ;;  %p302_p8 = por %p301_p5, %p300_p11 }
  0x27   : > { %p303_p9 = pnand %p302_p8, %p296_p12 }
  0x29   : > { %306 = shalt.err (!%p303_p9)
}
  0x2a   : > { %238 = dma.hbm_to_vmem [thread:$0]  (!%p454_p13), %s450_s25, 128, %s458_s27, %s88_s29  }
  0x2b   : > { %p556_p0 = scmp.lt.s32.totalorder %s373_s9, 3  ;;  %p557_p1 = scmp.ge.s32.totalorder %s373_s9, 1 }
  0x2d   : > { %p104_p3 = pnand %p557_p1, %p556_p0 }
  0x2e   : > { %s492_s21 = sand.u32 (!%p104_p3), 1, %s365_s7  }
  0x2f   : > { %107 = sbr.rel (%p104_p3) target bundleno = 81 (0x51), region = 24  ;;  %s225_s22 = sshll.u32 (!%p104_p3), %s492_s21, 3 }
  0x30   : > { %s110_s23 = scalar_lea.sflag (!%p104_p3), [#allocation3], %s492_s21  ;;  %s113_s24 = scalar_lea.vmem (!%p104_p3), [#allocation2], %s225_s22 }
  0x36   : > { %352 = dma.done.wait (%p430_p6), %s110_s23, 128  }
  0x37   : > { %354 = vsyncadd (%p430_p6), %s110_s23, 4294967168  ;;  %s131_s25 = scalar_lea.vmem [#allocation5], %s225_s22  ;;  %s228_s27 = sshll.u32 %s408_s10, 7  ;;  %v132_v0 = vld [vmem:[%s113_s24] sm:$0xff] }
  0x38   : > { %s149_s26 = sshll.u32 %s131_s25, 4  ;;  %v133_v1 = vmul.f32 0.017453292, %v132_v0  ;;  %s506_s30 = scalar_lea.hbm %s549_s1, %s228_s27  ;;  %s501_s26 = int_to_ptr.vmem [resolvable:$true] %s149_s26 }
  0x39   : > { %s136_s17 = scalar_lea.sflag [#allocation4], %s492_s21  ;;  %s307_s2 = scalar_lea.vmem %s501_s26, 128 }
  0x3a   : > { %134 = vst [vmem:[%s131_s25] sm:$0xff] %v133_v1  ;;  %p308_p6 = scmp.ne.s32.totalorder %s501_s26, %s307_s2  ;;  %p558_p11 = scmp.ne.s32.totalorder %s553_s18, 0 }
  0x3b   : > { %s376_s10 = smov [#allocation5]  }
  0x3c   : > { %p309_p12 = pnand %p308_p6, %p558_p11  ;;  %s311_s3 = sshll.u32 %s376_s10, 4  ;;  %s312_s3 = int_to_ptr.vmem [resolvable:$false] %s311_s3 }
  0x3d   : > { %s313_s4 = scalar_lea.vmem %s312_s3, 256  ;;  %p314_p7 = scmp.lt.s32.totalorder %s501_s26, %s312_s3 }
  0x3e   : > { %p310_p13 = pneg %p309_p12  ;;  %p315_p10 = scmp.lt.s32.totalorder %s313_s4, %s307_s2 }
  0x40   : > { %p316_p2 = por %p315_p10, %p314_p7 }
  0x42   : > { %p317_p4 = pnand %p316_p2, %p310_p13 }
  0x44   : > { %320 = shalt.err (!%p317_p4)
}
  0x45   : > { %s321_s5 = scalar_lea.hbm %s506_s30, 128  ;;  %s325_s14 = scalar_lea.hbm %s549_s1, 256 }
  0x46   : > { %p322_p5 = scmp.ne.s32.totalorder %s506_s30, %s321_s5  ;;  %p326_p0 = scmp.lt.u32.totalorder %s506_s30, %s549_s1 }
  0x47   : > { %p327_p1 = scmp.lt.u32.totalorder %s325_s14, %s321_s5  ;;  %p329_p6 = scmp.lt.u32.totalorder %s321_s5, %s506_s30 }
  0x48   : > { %p323_p8 = pnand %p322_p5, %p558_p11 }
  0x49   : > { %p328_p3 = por %p327_p1, %p326_p0 }
  0x4a   : > { %p324_p9 = pneg %p323_p8 }
  0x4b   : > { %p330_p12 = por %p329_p6, %p328_p3 }
  0x4d   : > { %p331_p13 = pnand %p330_p12, %p324_p9 }
  0x4f   : > { %334 = shalt.err (!%p331_p13)
}
  0x50   : > { %233 = dma.vmem_to_hbm [thread:$0]  (%p558_p11), %s501_s26, 128, %s506_s30, %s136_s17  }
  0x51 PF: > { %s161_s21 = sand.u32 1, %s361_s6   ;;  %p559_p7 = scmp.ne.s32.totalorder %s554_s19, 0 }
  0x52   : > { %p560_p10 = scmp.ge.s32.totalorder %s373_s9, 2  ;;  %s162_s22 = scalar_lea.sflag [#allocation4], %s161_s21 }
  0x54   : > { %p240_p2 = pnand %p560_p10, %p559_p7 }
  0x56   : > { %356 = dma.done.wait (!%p240_p2), %s162_s22, 128  }
  0x57   : > { %358 = vsyncadd (!%p240_p2), %s162_s22, 4294967168  ;;  %p14_p4 = scmp.ge.s32.totalorder %s412_s12, 4   ;;  %s561_s6 = smov %s365_s7 }
  0x58   : > { %s562_s7 = smov %s369_s8  ;;  %s563_s8 = smov %s424_s15 }
  0x59   : > { %s564_s9 = smov %s412_s12  ;;  %16 = sbr.rel (!%p14_p4) target bundleno = 5 (0x5), region = 69 }
  0x60   :  { %167 = vsyncpa [#allocation3], 1 }
  0x61   :  { %169 = vsyncpa [#allocation3 + $0x1], 1 }
  0x62   :  { %170 = vsyncpa [#allocation4], 1 }
  0x63   :  { %172 = vsyncpa [#allocation4 + $0x1], 1 }

</bundles_post_ra>
